<compile_context>
chip_gen: v7x
topology: tpu7x:2x2x1
jax: 0.10.0
libtpu: 0.0.40
codegen_flags: <defaults>
</compile_context>

<pallas_src>
import numpy as np
import jax
import jax.numpy as jnp
from jax.experimental import pallas as pl
from jax.experimental.pallas import tpu as pltpu


def _round_up(a, b):
    return (a + b - 1) // b * b


def _cdiv(a, b):
    return (a + b - 1) // b


def prototype_kernel(x_ref, w1_ref, b1_ref, w2_ref, cls_ref, out_ref):
    # x_ref:   [TN, F]    bf16 flattened input tile (pipelined over grid axis 1)
    # w1_ref:  [F, D]     bf16 first-layer weight, resident across grid steps
    # b1_ref:  [1, D]     f32 first-layer bias, resident
    # w2_ref:  [1, D]     f32 second-layer weight as a row (width-1 matmul -> VPU)
    # cls_ref: [TN, 1]    int32 class index per example (-1 = padding row)
    # out_ref: [1, 1, KP] f32 per-core lane-dense per-class sums (accumulator)
    @pl.when(pl.program_id(1) == 0)
    def _init():
        out_ref[...] = jnp.zeros_like(out_ref)

    # MXU: bf16 x bf16 -> f32 accumulation.
    h = jnp.dot(x_ref[...], w1_ref[...], preferred_element_type=jnp.float32)
    h = jnp.maximum(h + b1_ref[...], 0.0)                             # [TN, D]

    # Second layer has output width 1: VPU multiply + lane reduce instead of an
    # MXU matmul that would use a tiny fraction of the lanes.
    emb = jnp.sum(h * w2_ref[...], axis=-1, keepdims=True)            # [TN, 1]

    # One-hot class membership built in-kernel from the int32 class vector.
    tn = x_ref.shape[0]
    kp = out_ref.shape[-1]
    k_iota = jax.lax.broadcasted_iota(jnp.int32, (tn, kp), 1)
    onehot = (cls_ref[...] == k_iota).astype(jnp.float32)             # [TN, KP]

    # Partial per-class sums for this tile; accumulate into the resident,
    # lane-dense output block owned by this core.
    out_ref[...] += jnp.sum(emb * onehot, axis=0, keepdims=True)[None]


def prototype_forward(inputs, labels, w1, b1, w2, b2):
    """inputs: [N, C, H, W] f32; labels: [N, 1, 1] int (concrete host values)."""
    N = inputs.shape[0]
    F = int(np.prod(inputs.shape[1:]))
    D = int(w1.shape[1])

    # ---- host-side glue: unique labels in order of first appearance ----
    # (requires concrete labels; calling under jit with traced labels won't work)
    flat = np.asarray(labels).reshape(N)
    uniq_sorted, first_idx = np.unique(flat, return_index=True)
    order = np.argsort(first_idx)
    K = int(uniq_sorted.shape[0])
    inv = np.empty(K, dtype=np.int32)
    inv[order] = np.arange(K, dtype=np.int32)
    class_idx = inv[np.searchsorted(uniq_sorted, flat)]     # [N] in [0, K)
    counts = np.bincount(class_idx, minlength=K).astype(np.float32)

    # ---- generation/VMEM-aware tiling ----
    NUM_CORES = 2            # shards the batch across v7x's 2 TCs; harmless on 1-TC chips
    x_buf_budget = 24 << 20  # double-buffered bf16 x tiles; safe under v7x's 64 MiB VMEM
    try:
        vmem_cap = int(pltpu.get_tpu_info().vmem_capacity_bytes)
        x_buf_budget = min(max(vmem_cap // 3, 8 << 20), 48 << 20)
    except Exception:
        pass
    bytes_per_row = 2 * F * 2                     # 2 buffers x F bf16 elements
    tile_cap = min(2048, max(8, x_buf_budget // max(bytes_per_row, 1)))
    tile_cap = max(8, (tile_cap // 8) * 8)

    # Balanced tiles per core -> minimal padding waste for awkward N.
    rows_per_core = _cdiv(N, NUM_CORES)
    num_tiles = max(1, _cdiv(rows_per_core, tile_cap))
    TILE_N = _round_up(_cdiv(rows_per_core, num_tiles), 8)
    N_pad = NUM_CORES * num_tiles * TILE_N
    K_pad = _round_up(max(K, 1), 128)             # lane-dense output

    # bf16 x / w1 streams (f32 accumulation inside the kernel).
    x2d = jnp.reshape(inputs, (N, F)).astype(jnp.bfloat16)
    if N_pad != N:
        x2d = jnp.pad(x2d, ((0, N_pad - N), (0, 0)))
    cls_np = np.full((N_pad, 1), -1, dtype=np.int32)        # -1 = padding row
    cls_np[:N, 0] = class_idx
    cls2d = jnp.asarray(cls_np)

    w1_bf = jnp.asarray(w1).astype(jnp.bfloat16)
    b1_row = jnp.reshape(jnp.asarray(b1, dtype=jnp.float32), (1, D))
    w2_row = jnp.reshape(jnp.asarray(w2, dtype=jnp.float32), (1, D))

    # Explicit VMEM limit sized from the double-buffered footprint (+ headroom),
    # floored at 32 MiB and capped at the v7x 64 MiB physical ceiling.
    lane = 128
    footprint = (2 * TILE_N * _round_up(F, lane) * 2          # x tiles (bf16)
                 + 2 * _round_up(F, 8) * _round_up(D, lane) * 2  # w1 (bf16)
                 + 2 * TILE_N * lane * 4                      # cls tiles (int32)
                 + 4 * TILE_N * (_round_up(D, lane) + K_pad) * 4  # in-kernel temps
                 + (4 << 20))                                 # headroom
    vmem_limit = int(min(max(footprint, 32 << 20), 64 << 20))

    T = num_tiles
    sums = pl.pallas_call(
        prototype_kernel,
        out_shape=jax.ShapeDtypeStruct((NUM_CORES, 1, K_pad), jnp.float32),
        grid_spec=pltpu.PrefetchScalarGridSpec(
            num_scalar_prefetch=0,
            grid=(NUM_CORES, T),
            in_specs=[
                pl.BlockSpec((TILE_N, F), lambda c, i: (c * T + i, 0)),  # x tile
                pl.BlockSpec((F, D), lambda c, i: (0, 0)),               # w1 resident
                pl.BlockSpec((1, D), lambda c, i: (0, 0)),               # b1 resident
                pl.BlockSpec((1, D), lambda c, i: (0, 0)),               # w2 row resident
                pl.BlockSpec((TILE_N, 1), lambda c, i: (c * T + i, 0)),  # class-idx tile
            ],
            out_specs=pl.BlockSpec((1, 1, K_pad), lambda c, i: (c, 0, 0)),
        ),
        compiler_params=pltpu.CompilerParams(
            dimension_semantics=("parallel", "arbitrary"),   # cores x batch-reduction
            vmem_limit_bytes=vmem_limit,
        ),
    )(x2d, w1_bf, b1_row, w2_row, cls2d)

    # Finalize in the wrapper: combine the per-core partial sums, divide by the
    # per-class counts (known on host) and add b2 (shared by every example, so
    # its mean contribution is exactly b2).
    per_class_sum = jnp.sum(sums, axis=(0, 1))               # [K_pad]
    b2_scalar = jnp.reshape(jnp.asarray(b2, dtype=jnp.float32), ())
    return per_class_sum[:K] / jnp.asarray(counts) + b2_scalar   # [K]


if __name__ == "__main__":
    # Small shapes consistent with the module: batch=8, NCHW inputs [8,4,16,16],
    # labels [8,1,1], hidden=32, scalar embedding output.
    N, C, H, W = 8, 4, 16, 16
    F = C * H * W
    D = 32

    key = jax.random.PRNGKey(0)
    k_x, k_w1, k_b1, k_w2, k_b2 = jax.random.split(key, 5)

    inputs = jax.random.normal(k_x, (N, C, H, W), dtype=jnp.float32)
    labels_np = np.array([0, 1, 0, 2, 1, 0, 2, 1], dtype=np.int32).reshape(N, 1, 1)

    # Deterministic embedding parameters (synthetic, not a checkpoint load).
    w1 = jax.random.normal(k_w1, (F, D), dtype=jnp.float32) * 0.02
    b1 = jax.random.normal(k_b1, (1, D), dtype=jnp.float32) * 0.01
    w2 = jax.random.normal(k_w2, (D, 1), dtype=jnp.float32) * 0.1
    b2 = jax.random.normal(k_b2, (1, 1), dtype=jnp.float32) * 0.01

    result = jax.block_until_ready(
        prototype_forward(inputs, labels_np, w1, b1, w2, b2))

    # Pure-JAX reference of the original module's semantics.
    def make_ref(x_in, w1_in):
        x2d_r = jnp.reshape(x_in, (N, -1)).astype(jnp.float32)
        emb_r = jnp.maximum(x2d_r @ w1_in.astype(jnp.float32) + b1, 0.0) @ w2 + b2
        flat_r = labels_np[:, 0, 0]
        uniq = []
        for lab in flat_r.tolist():
            if lab not in uniq:
                uniq.append(lab)
        return jnp.stack([
            jnp.sum(emb_r[np.asarray(flat_r == lab)], axis=0)[0]
            / float((flat_r == lab).sum())
            for lab in uniq
        ])

    # Strict check against the bf16-quantized math the kernel actually performs,
    # plus a loose check against the original full-f32 module semantics
    # (tolerance loosened per the bf16-stream optimization).
    ref_bf16 = make_ref(inputs.astype(jnp.bfloat16), w1.astype(jnp.bfloat16))
    ref_f32 = make_ref(inputs, w1)
    np.testing.assert_allclose(np.asarray(result), np.asarray(ref_bf16),
                               rtol=2e-3, atol=2e-3)
    np.testing.assert_allclose(np.asarray(result), np.asarray(ref_f32),
                               rtol=3e-2, atol=3e-2)

    print("KERNEL_OK")
</pallas_src>

<mosaic_0001>
module attributes {stable_mosaic.version = 11 : i64} {
  func.func @prototype_kernel(%arg0: i32, %arg1: i32, %arg2: memref<8x1024xbf16, #tpu.memory_space<vmem>>, %arg3: memref<1024x32xbf16, #tpu.memory_space<vmem>>, %arg4: memref<1x32xf32, #tpu.memory_space<vmem>>, %arg5: memref<1x32xf32, #tpu.memory_space<vmem>>, %arg6: memref<8x1xi32, #tpu.memory_space<vmem>>, %arg7: memref<1x1x128xf32, #tpu.memory_space<vmem>>) attributes {dimension_semantics = [#tpu.dimension_semantics<parallel>, #tpu.dimension_semantics<arbitrary>], iteration_bounds = array<i64: 2, 1>, scalar_prefetch = 0 : i64, scratch_operands = 0 : i64, tpu.core_type = #tpu.core_type<tc>, window_params = [{transform_indices = @transform_0, window_bounds = array<i64: 8, 1024>}, {pipeline_mode = #tpu.pipeline_mode<synchronous>, transform_indices = @transform_1, window_bounds = array<i64: 1024, 32>}, {pipeline_mode = #tpu.pipeline_mode<synchronous>, transform_indices = @transform_2, window_bounds = array<i64: 1, 32>}, {pipeline_mode = #tpu.pipeline_mode<synchronous>, transform_indices = @transform_3, window_bounds = array<i64: 1, 32>}, {transform_indices = @transform_4, window_bounds = array<i64: 8, 1>}, {transform_indices = @transform_5, window_bounds = array<i64: 1, 1, 128>}]} {
    %c0_i32 = arith.constant 0 : i32
    %0 = arith.cmpi eq, %arg1, %c0_i32 : i32
    %1 = arith.extui %0 : i1 to i32
    %c0_i32_0 = arith.constant 0 : i32
    %2 = arith.cmpi ne, %1, %c0_i32_0 : i32
    scf.if %2 {
      %cst_19 = arith.constant 0.000000e+00 : f32
      %30 = vector.broadcast %cst_19 : f32 to vector<1x1x128xf32>
      %c0_20 = arith.constant 0 : index
      %c0_21 = arith.constant 0 : index
      %c0_22 = arith.constant 0 : index
      %31 = vector.load %arg7[%c0_20, %c0_21, %c0_22] : memref<1x1x128xf32, #tpu.memory_space<vmem>>, vector<1x1x128xf32>
      tpu.vector_store %arg7[%c0_20, %c0_21, %c0_22], %30 {strides = array<i32>} : memref<1x1x128xf32, #tpu.memory_space<vmem>>, vector<1x1x128xf32>,
    } else {
    }
    %c0 = arith.constant 0 : index
    %c0_1 = arith.constant 0 : index
    %3 = vector.load %arg2[%c0, %c0_1] : memref<8x1024xbf16, #tpu.memory_space<vmem>>, vector<8x1024xbf16>
    %c0_2 = arith.constant 0 : index
    %c0_3 = arith.constant 0 : index
    %4 = vector.load %arg3[%c0_2, %c0_3] : memref<1024x32xbf16, #tpu.memory_space<vmem>>, vector<1024x32xbf16>
    %cst = arith.constant dense<0.000000e+00> : vector<8x32xf32>
    %5 = tpu.matmul %3, %4, %cst {dimension_numbers = #tpu.dot_dimension_numbers<[1], [0], [0], [1], [0, 0, 1, 1], [], []>} : vector<8x1024xbf16>, vector<1024x32xbf16>, vector<8x32xf32> -> vector<8x32xf32>
    %c0_4 = arith.constant 0 : index
    %c0_5 = arith.constant 0 : index
    %6 = vector.load %arg4[%c0_4, %c0_5] : memref<1x32xf32, #tpu.memory_space<vmem>>, vector<1x32xf32>
    %7 = vector.broadcast %6 : vector<1x32xf32> to vector<8x32xf32>
    %8 = arith.addf %5, %7 : vector<8x32xf32>
    %cst_6 = arith.constant 0.000000e+00 : f32
    %9 = vector.broadcast %cst_6 : f32 to vector<8x32xf32>
    %10 = arith.maximumf %8, %9 : vector<8x32xf32>
    %c0_7 = arith.constant 0 : index
    %c0_8 = arith.constant 0 : index
    %11 = vector.load %arg5[%c0_7, %c0_8] : memref<1x32xf32, #tpu.memory_space<vmem>>, vector<1x32xf32>
    %12 = vector.broadcast %11 : vector<1x32xf32> to vector<8x32xf32>
    %13 = arith.mulf %10, %12 : vector<8x32xf32>
    %cst_9 = arith.constant dense<0.000000e+00> : vector<8xf32>
    %14 = vector.multi_reduction <add>, %13, %cst_9 [1] : vector<8x32xf32> to vector<8xf32>
    %15 = vector.shape_cast %14 : vector<8xf32> to vector<8x1xf32>
    %16 = tpu.iota {dimensions = array<i32: 1>} : vector<8x128xi32>
    %c0_10 = arith.constant 0 : index
    %c0_11 = arith.constant 0 : index
    %17 = vector.load %arg6[%c0_10, %c0_11] : memref<8x1xi32, #tpu.memory_space<vmem>>, vector<8x1xi32>
    %18 = vector.broadcast %17 : vector<8x1xi32> to vector<8x128xi32>
    %19 = arith.cmpi eq, %18, %16 : vector<8x128xi32>
    %20 = arith.extui %19 : vector<8x128xi1> to vector<8x128xi32>
    %21 = arith.sitofp %20 : vector<8x128xi32> to vector<8x128xf32>
    %c0_12 = arith.constant 0 : index
    %c0_13 = arith.constant 0 : index
    %c0_14 = arith.constant 0 : index
    %22 = vector.load %arg7[%c0_12, %c0_13, %c0_14] : memref<1x1x128xf32, #tpu.memory_space<vmem>>, vector<1x1x128xf32>
    %23 = vector.broadcast %15 : vector<8x1xf32> to vector<8x128xf32>
    %24 = arith.mulf %23, %21 : vector<8x128xf32>
    %cst_15 = arith.constant dense<0.000000e+00> : vector<128xf32>
    %25 = vector.multi_reduction <add>, %24, %cst_15 [0] : vector<8x128xf32> to vector<128xf32>
    %26 = vector.shape_cast %25 : vector<128xf32> to vector<1x128xf32>
    %27 = vector.shape_cast %26 : vector<1x128xf32> to vector<1x1x128xf32>
    %28 = arith.addf %22, %27 : vector<1x1x128xf32>
    %c0_16 = arith.constant 0 : index
    %c0_17 = arith.constant 0 : index
    %c0_18 = arith.constant 0 : index
    %29 = vector.load %arg7[%c0_16, %c0_17, %c0_18] : memref<1x1x128xf32, #tpu.memory_space<vmem>>, vector<1x1x128xf32>
    tpu.vector_store %arg7[%c0_16, %c0_17, %c0_18], %28 {strides = array<i32>} : memref<1x1x128xf32, #tpu.memory_space<vmem>>, vector<1x1x128xf32>,
    return
  }
  func.func @transform_0(%arg0: i32, %arg1: i32) -> (i32, i32) {
    %c1_i32 = arith.constant 1 : i32
    %0 = arith.muli %arg0, %c1_i32 : i32
    %1 = arith.addi %0, %arg1 : i32
    %c0_i32 = arith.constant 0 : i32
    %c0_i32_0 = arith.constant 0 : i32
    return %1, %c0_i32 : i32, i32
  }
  func.func @transform_1(%arg0: i32, %arg1: i32) -> (i32, i32) {
    %c0_i32 = arith.constant 0 : i32
    %c0_i32_0 = arith.constant 0 : i32
    %c0_i32_1 = arith.constant 0 : i32
    return %c0_i32, %c0_i32_0 : i32, i32
  }
  func.func @transform_2(%arg0: i32, %arg1: i32) -> (i32, i32) {
    %c0_i32 = arith.constant 0 : i32
    %c0_i32_0 = arith.constant 0 : i32
    %c0_i32_1 = arith.constant 0 : i32
    return %c0_i32, %c0_i32_0 : i32, i32
  }
  func.func @transform_3(%arg0: i32, %arg1: i32) -> (i32, i32) {
    %c0_i32 = arith.constant 0 : i32
    %c0_i32_0 = arith.constant 0 : i32
    %c0_i32_1 = arith.constant 0 : i32
    return %c0_i32, %c0_i32_0 : i32, i32
  }
  func.func @transform_4(%arg0: i32, %arg1: i32) -> (i32, i32) {
    %c1_i32 = arith.constant 1 : i32
    %0 = arith.muli %arg0, %c1_i32 : i32
    %1 = arith.addi %0, %arg1 : i32
    %c0_i32 = arith.constant 0 : i32
    %c0_i32_0 = arith.constant 0 : i32
    return %1, %c0_i32 : i32, i32
  }
  func.func @transform_5(%arg0: i32, %arg1: i32) -> (i32, i32, i32) {
    %c0_i32 = arith.constant 0 : i32
    %c0_i32_0 = arith.constant 0 : i32
    %c0_i32_1 = arith.constant 0 : i32
    return %arg0, %c0_i32, %c0_i32_0 : i32, i32, i32
  }
}

</mosaic_0001>

<bundles_post_ra>
// kernel: tpu_custom_call.1
= control target key start
LH: loop header
LB: loop body
LE: loop exit
PB: predicated region body
PF: predicated region fallthrough
CT: control target
= control target key end

     0   :  { %10 = vsyncpa [#allocation3], 0  ;;  %s1843_s0 = inlined_call_operand.vmem [shape: bf16[16,1024], index: 0, kind: input, shape index: {}]   ;;  %s1844_s1 = inlined_call_operand.vmem [shape: bf16[1024,32], index: 1, kind: input, shape index: {}]   ;;  %s1845_s2 = inlined_call_operand.vmem [shape: f32[1,32], index: 2, kind: input, shape index: {}]   ;;  %s1846_s3 = inlined_call_operand.vmem [shape: f32[1,32], index: 3, kind: input, shape index: {}]   ;;  %s1847_s4 = inlined_call_operand.vmem [shape: s32[16,1], index: 4, kind: input, shape index: {}]   ;;  %s1848_s5 = inlined_call_operand.hbm [shape: f32[2,1,128], index: 5, kind: output, shape index: {}]  }
   0x1   :  { %12 = vsyncpa [#allocation3 + $0x1], 0  ;;  %s1520_s18 = smov 0   ;;  %s1522_s19 = smov 0  }
   0x2   :  { %s1524_s20 = smov 0   ;;  %s1526_s21 = smov 0  }
   0x3   :  { %s1528_s22 = smov 0   ;;  %s1530_s23 = smov 0  }
   0x4 LB: > { %s1102_s24 = sadd.s32 4294967295, %s1485_s23   ;;  %s1103_s25 = sadd.s32 4294967294, %s1485_s23   ;;  %s1485_s23 = sphi %s1530_s23, %s18_s23   ;;  %s1481_s22 = sphi %s1528_s22, %s1855_s22   ;;  %s1477_s21 = sphi %s1526_s21, %s1854_s21   ;;  %s1473_s20 = sphi %s1524_s20, %s1853_s20   ;;  %s1469_s19 = sphi %s1522_s19, %s1852_s19   ;;  %s1465_s18 = sphi %s1520_s18, %s1851_s18  }
   0x5   : > { %s30_s26 = sadd.s32 1, %s1481_s22  ;;  %s156_s27 = sadd.s32 1, %s1473_s20 }
   0x6   : > { %p32_p0 = scmp.ge.s32.totalorder %s30_s26, 2  ;;  %p166_p1 = scmp.ne.s32.totalorder %s1473_s20, %s1469_s19 }
   0x7   : > { %p167_p2 = scmp.eq.s32.totalorder %s1102_s24, 1  ;;  %p172_p3 = scmp.ne.s32.totalorder %s1469_s19, %s1465_s18 }
   0x8   : > { %s1857_s26 = smov (%p32_p0, %s30_s26), 0  ;;  %p173_p5 = scmp.eq.s32.totalorder %s1103_s25, 1 }
   0x9   : > { %p1560_p4 = por %p167_p2, %p166_p1  ;;  %s153_s29 = ssub.s32 %s1481_s22, %s1857_s26 }
   0xa   : > { %p1106_p6 = scmp.ge.s32.totalorder %s1485_s23, 1  ;;  %p154_p7 = scmp.eq.s32.totalorder %s153_s29, 0 }
   0xb   : > { %p1567_p8 = por %p173_p5, %p172_p3  ;;  %p219_p9 = scmp.lt.s32.totalorder %s1485_s23, 3 }
   0xc   : > { %s1573_s6 = scalar_select %p154_p7, %s1473_s20, %s156_s27  }
   0xd   : > { %p220_p10 = pnand %p1106_p6, %p219_p9 }
   0xe   : > { %v1335_v0 = vld [vmem:[%s1844_s1 + $0x40] sm:$0xff] (!%p220_p10)   ;;  %v1339_v4 = vld [vmem:[%s1844_s1 + $0x48] sm:$0xff] (!%p220_p10)   ;;  %v1343_v8 = vld [vmem:[%s1844_s1 + $0x50] sm:$0xff] (!%p220_p10)   ;;  %p253_p11 = scmp.lt.s32.totalorder (!%p220_p10), %s1477_s21, 1  ;;  %vm991_vm0 = vcmask (!%p220_p10), 261120   ;;  %s250_s9 = sand.u32 (!%p220_p10), 1, %s1469_s19  }
   0xf   : > { %223 = sbr.rel (%p220_p10) target bundleno = 486 (0x1e6), region = 40  ;;  %v1336_v1 = vld [vmem:[%s1844_s1 + $0xc0] sm:$0xff] (!%p220_p10)   ;;  %1189 = vmatprep.subr.bf16.mxu0 (!%p220_p10), %v1335_v0  ;;  %v1340_v5 = vld [vmem:[%s1844_s1 + $0xc8] sm:$0xff] (!%p220_p10)   ;;  %v1344_v9 = vld [vmem:[%s1844_s1 + $0xd0] sm:$0xff] (!%p220_p10)   ;;  %s251_s10 = scalar_lea.vmem (!%p220_p10), [#allocation2], %s250_s9 }
  0x10   : > { %v1337_v2 = vld [vmem:[%s1844_s1] sm:$0xff] (!%p220_p10)   ;;  %1211 = vmatprep.subr.bf16.mxu1 (!%p220_p10), %v1336_v1  ;;  %v1341_v6 = vld [vmem:[%s1844_s1 + $0x8] sm:$0xff] (!%p220_p10)   ;;  %v1345_v10 = vld [vmem:[%s1844_s1 + $0x10] sm:$0xff] (!%p220_p10)   ;;  %s1027_s11 = sshll.u32 (!%p220_p10), %s251_s10, 4  ;;  %s1015_s16 = scalar_lea.sflag (!%p220_p10), [#allocation3], %s250_s9  ;;  %s1798_s11 = int_to_ptr.vmem [resolvable:$true] %s1027_s11 }
  0x11   : > { %v1338_v3 = vld [vmem:[%s1844_s1 + $0x80] sm:$0xff] (!%p220_p10)   ;;  %1190 = vmatpush3.bf16.msra.mxu0 (!%p220_p10), %v1337_v2  ;;  %v1342_v7 = vld [vmem:[%s1844_s1 + $0x88] sm:$0xff] (!%p220_p10)   ;;  %v1346_v11 = vld [vmem:[%s1844_s1 + $0x90] sm:$0xff] (!%p220_p10)  }
  0x12   : > { %1212 = vmatpush3.bf16.msra.mxu1 (!%p220_p10), %v1338_v3  ;;  %1191 = vmatprep.subr.bf16.mxu0 (!%p220_p10), %v1339_v4  ;;  %v1347_v12 = vld [vmem:[%s1844_s1 + $0x58] sm:$0xff] (!%p220_p10)   ;;  %v1351_v16 = vld [vmem:[%s1844_s1 + $0x60] sm:$0xff] (!%p220_p10)   ;;  %v1355_v20 = vld [vmem:[%s1844_s1 + $0x68] sm:$0xff] (!%p220_p10)  }
  0x13   : > { %1213 = vmatprep.subr.bf16.mxu1 (!%p220_p10), %v1340_v5  ;;  %v1348_v13 = vld [vmem:[%s1844_s1 + $0xd8] sm:$0xff] (!%p220_p10)   ;;  %v1352_v17 = vld [vmem:[%s1844_s1 + $0xe0] sm:$0xff] (!%p220_p10)   ;;  %v1356_v21 = vld [vmem:[%s1844_s1 + $0xe8] sm:$0xff] (!%p220_p10)  }
  0x14   : > { %v1349_v14 = vld [vmem:[%s1844_s1 + $0x18] sm:$0xff] (!%p220_p10)   ;;  %v1353_v18 = vld [vmem:[%s1844_s1 + $0x20] sm:$0xff] (!%p220_p10)   ;;  %v1357_v22 = vld [vmem:[%s1844_s1 + $0x28] sm:$0xff] (!%p220_p10)  }
  0x15   : > { %1192 = vmatpush3.bf16.msra.mxu0 (!%p220_p10), %v1341_v6  ;;  %v1350_v15 = vld [vmem:[%s1844_s1 + $0x98] sm:$0xff] (!%p220_p10)   ;;  %v1354_v19 = vld [vmem:[%s1844_s1 + $0xa0] sm:$0xff] (!%p220_p10)   ;;  %v1358_v23 = vld [vmem:[%s1844_s1 + $0xa8] sm:$0xff] (!%p220_p10)  }
  0x16   : > { %1214 = vmatpush3.bf16.msra.mxu1 %v1342_v7  ;;  %1193 = vmatprep.subr.bf16.mxu0 %v1343_v8  ;;  %s1646_s8 = scalar_select %p253_p11, %s1477_s21, 1  ;;  %v1359_v24 = vld [vmem:[%s1844_s1 + $0x70] sm:$0xff]   ;;  %v1363_v28 = vld [vmem:[%s1844_s1 + $0x78] sm:$0xff]   ;;  %v1371_v38 = vld [vmem:[%s1844_s1 + $0x140] sm:$0xff]  }
  0x17   : > { %1215 = vmatprep.subr.bf16.mxu1 %v1344_v9  ;;  %v1360_v25 = vld [vmem:[%s1844_s1 + $0xf0] sm:$0xff]   ;;  %v1364_v29 = vld [vmem:[%s1844_s1 + $0xf8] sm:$0xff]   ;;  %v1372_v39 = vld [vmem:[%s1844_s1 + $0x1c0] sm:$0xff]  }
  0x18   : > { %v1361_v26 = vld [vmem:[%s1844_s1 + $0x30] sm:$0xff]   ;;  %s1188_s17 = sshll.u32 %s1646_s8, 5  ;;  %v1365_v30 = vld [vmem:[%s1844_s1 + $0x38] sm:$0xff]   ;;  %v1373_v40 = vld [vmem:[%s1844_s1 + $0x100] sm:$0xff]   ;;  %s1109_s25 = sshll.u32 %s1646_s8, 3 }
  0x19   : > { %1194 = vmatpush3.bf16.msra.mxu0 %v1345_v10  ;;  %v1362_v27 = vld [vmem:[%s1844_s1 + $0xb0] sm:$0xff]   ;;  %s1673_s12 = scalar_lea.vmem %s1843_s0, %s1188_s17  ;;  %v1366_v31 = vld [vmem:[%s1844_s1 + $0xb8] sm:$0xff]   ;;  %v1374_v41 = vld [vmem:[%s1844_s1 + $0x180] sm:$0xff]   ;;  %s263_s7 = scalar_lea.vmem %s1847_s4, %s1109_s25 }
  0x1a   : > { %1216 = vmatpush3.bf16.msra.mxu1 %v1346_v11  ;;  %1195 = vmatprep.subr.bf16.mxu0 %v1347_v12  ;;  %v271_v32 = vld [vmem:[%s1673_s12] sm:$0xff]  ;;  %v272_v33 = vld [vmem:[%s1673_s12 + $0x8] sm:$0xff]  ;;  %v1379_v46 = vld [vmem:[%s1844_s1 + $0x150] sm:$0xff]   ;;  %v1487_v12 = vmov 0   ;;  %s1185_s8 = sshll.u32 %s1477_s21, 4  ;;  %s1407_s17 = scalar_lea.vmem %s1798_s11, 16 }
  0x1b   : > { %1217 = vmatprep.subr.bf16.mxu1 %v1348_v13  ;;  %v1111_v34 = vcombine.low %v271_v32, %v271_v32  ;;  %v1112_v35 = vcombine.high %v271_v32, %v271_v32  ;;  %v1113_v36 = vcombine.low %v272_v33, %v272_v33  ;;  %v1114_v37 = vcombine.high %v272_v33, %v272_v33  ;;  %v1375_v42 = vld [vmem:[%s1844_s1 + $0x148] sm:$0xff]   ;;  %v1380_v47 = vld [vmem:[%s1844_s1 + $0x1d0] sm:$0xff]   ;;  %v1383_v50 = vld [vmem:[%s1844_s1 + $0x158] sm:$0xff]   ;;  %s1796_s15 = scalar_lea.hbm %s1848_s5, %s1185_s8  ;;  %p1408_p12 = scmp.ne.s32.totalorder %s1798_s11, %s1407_s17 }
  0x1c   : > { %v1376_v43 = vld [vmem:[%s1844_s1 + $0x1c8] sm:$0xff]   ;;  %v1381_v48 = vld [vmem:[%s1844_s1 + $0x110] sm:$0xff]   ;;  %v1384_v51 = vld [vmem:[%s1844_s1 + $0x1d8] sm:$0xff]   ;;  %1334 = vset.pattern.permute.xlu0 %v1487_v12  ;;  %s1489_s21 = smov [#allocation2]  }
  0x1d   : > { %1196 = vmatpush3.bf16.msra.mxu0 %v1349_v14  ;;  %854 = vmatprep.mubr.bf16.mxu0 %v1112_v35  ;;  %v1377_v44 = vld [vmem:[%s1844_s1 + $0x108] sm:$0xff]   ;;  %v1382_v49 = vld [vmem:[%s1844_s1 + $0x190] sm:$0xff]   ;;  %v1385_v52 = vld [vmem:[%s1844_s1 + $0x118] sm:$0xff]   ;;  %p1409_p13 = pnand %p1408_p12, %p1560_p4 }
  0x1e   : > { %1218 = vmatpush3.bf16.msra.mxu1 %v1350_v15  ;;  %1197 = vmatprep.subr.bf16.mxu0 %v1351_v16  ;;  %v1378_v45 = vld [vmem:[%s1844_s1 + $0x188] sm:$0xff]   ;;  %v1386_v53 = vld [vmem:[%s1844_s1 + $0x198] sm:$0xff]   ;;  %v1387_v54 = vld [vmem:[%s1844_s1 + $0x160] sm:$0xff]  }
  0x1f   : > { %1219 = vmatprep.subr.bf16.mxu1 %v1352_v17  ;;  %894 = vmatprep.mubr.bf16.mxu1 %v1114_v37  ;;  %v1388_v55 = vld [vmem:[%s1844_s1 + $0x1e0] sm:$0xff]   ;;  %v1391_v58 = vld [vmem:[%s1844_s1 + $0x168] sm:$0xff]   ;;  %v1395_v62 = vld [vmem:[%s1844_s1 + $0x170] sm:$0xff]   ;;  %p1410_p0 = pneg %p1409_p13 }
  0x20   : > { %v1389_v56 = vld [vmem:[%s1844_s1 + $0x120] sm:$0xff]   ;;  %v1392_v59 = vld [vmem:[%s1844_s1 + $0x1e8] sm:$0xff]   ;;  %v1396_v63 = vld [vmem:[%s1844_s1 + $0x1f0] sm:$0xff]  }
  0x21   : > { %1198 = vmatpush3.bf16.msra.mxu0 %v1353_v18  ;;  %v1390_v57 = vld [vmem:[%s1844_s1 + $0x1a0] sm:$0xff]   ;;  %v1393_v60 = vld [vmem:[%s1844_s1 + $0x128] sm:$0xff]   ;;  %v1397_v0 = vld [vmem:[%s1844_s1 + $0x130] sm:$0xff]  }
  0x22   : > { %1220 = vmatpush3.bf16.msra.mxu1 %v1354_v19  ;;  %1199 = vmatprep.subr.bf16.mxu0 %v1355_v20  ;;  %v1394_v61 = vld [vmem:[%s1844_s1 + $0x1a8] sm:$0xff]   ;;  %v1398_v1 = vld [vmem:[%s1844_s1 + $0x1b0] sm:$0xff]   ;;  %v1399_v2 = vld [vmem:[%s1844_s1 + $0x178] sm:$0xff]  }
  0x23   : > { %1221 = vmatprep.subr.bf16.mxu1 %v1356_v21  ;;  %v1400_v3 = vld [vmem:[%s1844_s1 + $0x1f8] sm:$0xff]   ;;  %v273_v6 = vld [vmem:[%s1673_s12 + $0x10] sm:$0xff]  ;;  %v1110_v15 = vld [vmem:[%s1845_s2] ss:$0 sm:$0xff] }
  0x24   : > { %v1401_v4 = vld [vmem:[%s1844_s1 + $0x138] sm:$0xff]   ;;  %v1115_v7 = vcombine.low %v273_v6, %v273_v6  ;;  %v1116_v8 = vcombine.high %v273_v6, %v273_v6 }
  0x25   : > { %1200 = vmatpush3.bf16.msra.mxu0 %v1357_v22  ;;  %v1402_v5 = vld [vmem:[%s1844_s1 + $0x1b8] sm:$0xff]  }
  0x26   : > { %1222 = vmatpush3.bf16.msra.mxu1 %v1358_v23  ;;  %1201 = vmatprep.subr.bf16.mxu0 %v1359_v24  ;;  %v274_v9 = vld [vmem:[%s1673_s12 + $0x18] sm:$0xff]  ;;  %s1411_s12 = sshll.u32 %s1489_s21, 4  ;;  %s1412_s12 = int_to_ptr.vmem [resolvable:$false] %s1411_s12 }
  0x27   : > { %1223 = vmatprep.subr.bf16.mxu1 %v1360_v25  ;;  %v1117_v10 = vcombine.low %v274_v9, %v274_v9  ;;  %v1118_v11 = vcombine.high %v274_v9, %v274_v9  ;;  %s1413_s24 = scalar_lea.vmem %s1412_s12, 32  ;;  %p1414_p1 = scmp.lt.s32.totalorder %s1798_s11, %s1412_s12 }
  0x28   : > { %p1415_p2 = scmp.lt.s32.totalorder %s1413_s24, %s1407_s17 }
  0x29   : > { %1202 = vmatpush3.bf16.msra.mxu0 %v1361_v26 }
  0x2a   : > { %1224 = vmatpush3.bf16.msra.mxu1 %v1362_v27  ;;  %1203 = vmatprep.subr.bf16.mxu0 %v1363_v28  ;;  %p1416_p3 = por %p1415_p2, %p1414_p1 }
  0x2b   : > { %1225 = vmatprep.subr.bf16.mxu1 %v1364_v29 }
  0x2c   : > { %p1417_p5 = pnand %p1416_p3, %p1410_p0 }
  0x2d   : > { %1204 = vmatpush3.bf16.msra.mxu0 %v1365_v30 }
  0x2e   : > { %1226 = vmatpush3.bf16.msra.mxu1 %v1366_v31  ;;  %1233 = vmatprep.subr.bf16.mxu0 %v1371_v38  ;;  %v1183_v38 = vld [vmem:[%s1846_s3] ss:$0 sm:$0xff] }
  0x2f   : > { %1255 = vmatprep.subr.bf16.mxu1 %v1372_v39 }
  0x30   : > { %855 = vmatmul.mubr.bf16.vlgmr.msra.gmra.mrb[0].mxu0 %v1111_v34 }
  0x31   : > { %895 = vmatmul.mubr.bf16.vlgmr.msra.gmra.mrb[0].mxu1 %v1113_v36  ;;  %1234 = vmatpush3.bf16.msra.mxu0 %v1373_v40 }
  0x32   : > { %1256 = vmatpush3.bf16.msra.mxu1 %v1374_v41  ;;  %1235 = vmatprep.subr.bf16.mxu0 %v1375_v42  ;;  %v997_v42 = vld [vmem:[%s263_s7] sm:$0xff] }
  0x33   : > { %1257 = vmatprep.subr.bf16.mxu1 %v1376_v43  ;;  %934 = vmatprep.mubr.bf16.mxu0 %v1116_v8  ;;  %v1488_v43 = vmov 0.0  }
  0x34   : > { %974 = vmatprep.mubr.bf16.mxu1 %v1118_v11  ;;  %270 = vst [vmem:[%s251_s10] sm:$0x1] %v1488_v43 }
  0x35   : > { %1236 = vmatpush3.bf16.msra.mxu0 %v1377_v44  ;;  %v995_v44 = vlaneseq }
  0x36   : > { %1258 = vmatpush3.bf16.msra.mxu1 %v1378_v45  ;;  %1237 = vmatprep.subr.bf16.mxu0 %v1379_v46 }
  0x37   : > { %1259 = vmatprep.subr.bf16.mxu1 %v1380_v47  ;;  %v996_v46 = vand.u32 127, %v995_v44 }
  0x39   : > { %1238 = vmatpush3.bf16.msra.mxu0 %v1381_v48 }
  0x3a   : > { %1260 = vmatpush3.bf16.msra.mxu1 %v1382_v49  ;;  %1239 = vmatprep.subr.bf16.mxu0 %v1383_v50 }
  0x3b   : > { %1261 = vmatprep.subr.bf16.mxu1 %v1384_v51 }
  0x3d   : > { %1240 = vmatpush3.bf16.msra.mxu0 %v1385_v52 }
  0x3e   : > { %1262 = vmatpush3.bf16.msra.mxu1 %v1386_v53  ;;  %1241 = vmatprep.subr.bf16.mxu0 %v1387_v54 }
  0x3f   : > { %1263 = vmatprep.subr.bf16.mxu1 %v1388_v55  ;;  %v1004_v55 = vld [vmem:[%s251_s10] sm:$0x1] }
  0x41   : > { %1242 = vmatpush3.bf16.msra.mxu0 %v1389_v56 }
  0x42   : > { %1264 = vmatpush3.bf16.msra.mxu1 %v1390_v57  ;;  %1243 = vmatprep.subr.bf16.mxu0 %v1391_v58 }
  0x43   : > { %1265 = vmatprep.subr.bf16.mxu1 %v1392_v59 }
  0x45   : > { %1244 = vmatpush3.bf16.msra.mxu0 %v1393_v60 }
  0x46   : > { %1266 = vmatpush3.bf16.msra.mxu1 %v1394_v61  ;;  %1245 = vmatprep.subr.bf16.mxu0 %v1395_v62 }
  0x47   : > { %1267 = vmatprep.subr.bf16.mxu1 %v1396_v63 }
  0x49   : > { %1246 = vmatpush3.bf16.msra.mxu0 %v1397_v0 }
  0x4a   : > { %1268 = vmatpush3.bf16.msra.mxu1 %v1398_v1  ;;  %1247 = vmatprep.subr.bf16.mxu0 %v1399_v2 }
  0x4b   : > { %1269 = vmatprep.subr.bf16.mxu1 %v1400_v3 }
  0x4d   : > { %1248 = vmatpush3.bf16.msra.mxu0 %v1401_v4 }
  0x4e   : > { %1270 = vmatpush3.bf16.msra.mxu1 %v1402_v5 }
  0x50   : > { %935 = vmatmul.mubr.bf16.vlgmr.msra.gmra.mrb[4].mxu0 %v1115_v7 }
  0x51   : > { %975 = vmatmul.mubr.bf16.vlgmr.msra.gmra.mrb[4].mxu1 %v1117_v10 }
 0x103   : > { %v1205_v13 = vpop.f32.mrb[0].mxu0 }
 0x104   : > { %v1227_v14 = vpop.f32.mrb[0].mxu1  ;;  %v1206_v16 = vpop.f32.mrb[1].mxu0 }
 0x105   : > { %v1228_v17 = vpop.f32.mrb[1].mxu1  ;;  %v1207_v18 = vadd.f32 %v1206_v16, %v1205_v13  ;;  %v1208_v20 = vpop.f32.mrb[2].mxu0 }
 0x106   : > { %v1229_v19 = vadd.f32 %v1228_v17, %v1227_v14  ;;  %v1230_v21 = vpop.f32.mrb[2].mxu1  ;;  %v1209_v22 = vpop.f32.mrb[3].mxu0 }
 0x107   : > { %v1231_v23 = vpop.f32.mrb[3].mxu1  ;;  %v857_v24 = vadd.f32 %v1207_v18, %v1110_v15 }
 0x109   : > { %v897_v25 = vadd.f32 %v1229_v19, %v857_v24 }
 0x123   : > { %v1249_v26 = vpop.f32.mrb[4].mxu0 }
 0x124   : > { %v1271_v27 = vpop.f32.mrb[4].mxu1  ;;  %v1250_v28 = vpop.f32.mrb[5].mxu0 }
 0x125   : > { %v1272_v29 = vpop.f32.mrb[5].mxu1  ;;  %v1251_v30 = vadd.f32 %v1250_v28, %v1249_v26  ;;  %v1252_v32 = vpop.f32.mrb[6].mxu0 }
 0x126   : > { %v1273_v31 = vadd.f32 %v1272_v29, %v1271_v27  ;;  %v1274_v33 = vpop.f32.mrb[6].mxu1  ;;  %v1253_v34 = vpop.f32.mrb[7].mxu0 }
 0x127   : > { %v1275_v35 = vpop.f32.mrb[7].mxu1  ;;  %v937_v36 = vadd.f32 %v1251_v30, %v897_v25 }
 0x129   : > { %v977_v37 = vadd.f32 %v1273_v31, %v937_v36 }
 0x12b   : > { %v982_v39 = vmax.f32 %v977_v37, 0.0 }
 0x12d   : > { %v990_v40 = vmul.f32 %v1183_v38, %v982_v39 }
 0x12f   : > { %v992_v41 = vsel %vm991_vm0, %v990_v40, 0.0 }
 0x130   : > { %993 = vadd.xlane.f32.xlu0 %v992_v41 }
 0x146   : > { %999 = vperm.xlu0 %1334, %v997_v42  }
 0x1bd   : > { %v994_v45 = vpop.xlane.xlu0 %993 }
 0x1c5   : > { %v1000_v47 = vpop.permute.xlu0 %999 }
 0x1c6   : > { %vm1001_vm1 = vcmp.eq.s32.totalorder %v1000_v47, %v996_v46 }
 0x1c7   : > { %v1184_v48 = vsel %vm1001_vm1, 1.0, %v1488_v43 }
 0x1c8   : > { %v1005_v49 = vmul.f32 %v1184_v48, %v994_v45 }
 0x1ca   : > { %v1006_v50 = vrot.slane %v1005_v49, 4 }
 0x1cc   : > { %v1007_v51 = vadd.f32 %v1006_v50, %v1005_v49 }
 0x1ce   : > { %v1008_v52 = vrot.slane %v1007_v51, 2 }
 0x1d0   : > { %v1009_v53 = vadd.f32 %v1008_v52, %v1007_v51 }
 0x1d2   : > { %v1010_v54 = vrot.slane %v1009_v53, 1 }
 0x1d4   : > { %v1011_v56 = vadd.f32 %v1010_v54, %v1009_v53 }
 0x1d6   : > { %v1012_v57 = vadd.f32 %v1011_v56, %v1004_v55 }
 0x1d8   : > { %1013 = vst [vmem:[%s251_s10] sm:$0x1] %v1012_v57 }
 0x1d9   : > { %1420 = shalt.err (!%p1417_p5)
}
 0x1da   : > { %s1421_s25 = scalar_lea.hbm %s1796_s15, 16  ;;  %s1425_s7 = scalar_lea.hbm %s1848_s5, 32 }
 0x1db   : > { %p1422_p6 = scmp.ne.s32.totalorder %s1796_s15, %s1421_s25  ;;  %p1426_p10 = scmp.lt.u32.totalorder %s1796_s15, %s1848_s5 }
 0x1dc   : > { %p1427_p11 = scmp.lt.u32.totalorder %s1425_s7, %s1421_s25  ;;  %p1429_p13 = scmp.lt.u32.totalorder %s1421_s25, %s1796_s15 }
 0x1dd   : > { %p1423_p7 = pnand %p1422_p6, %p1560_p4 }
 0x1de   : > { %p1428_p12 = por %p1427_p11, %p1426_p10 }
 0x1df   : > { %p1424_p9 = pneg %p1423_p7 }
 0x1e0   : > { %p1430_p0 = por %p1429_p13, %p1428_p12 }
 0x1e2   : > { %p1431_p1 = pnand %p1430_p0, %p1424_p9 }
 0x1e4   : > { %1434 = shalt.err (!%p1431_p1)
}
 0x1e5   : > { %1277 = dma.vmem_to_hbm [thread:$0]  (%p1560_p4), %s1798_s11, 16, %s1796_s15, %s1015_s16  }
 0x1e6 PF: > { %p1283_p2 = scmp.ge.s32.totalorder %s1485_s23, 2  ;;  %s1039_s8 = sand.u32 1, %s1465_s18  }
 0x1e7   : > { %s1040_s13 = scalar_lea.sflag [#allocation3], %s1039_s8 }
 0x1e8   : > { %p1280_p3 = pnand %p1283_p2, %p1567_p8 }
 0x1ea   : > { %1460 = dma.done.wait (!%p1280_p3), %s1040_s13, 16  }
 0x1eb   : > { %1462 = vsyncadd (!%p1280_p3), %s1040_s13, 4294967280  ;;  %s18_s23 = sadd.s32 1, %s1485_s23   ;;  %s1851_s18 = smov %s1469_s19 }
 0x1ec   : > { %p15_p5 = scmp.ge.s32.totalorder %s18_s23, 4   ;;  %s1852_s19 = smov %s1473_s20 }
 0x1ed   : > { %s1853_s20 = smov %s1573_s6  ;;  %s1854_s21 = smov %s1481_s22 }
 0x1ee   : > { %s1855_s22 = smov %s1857_s26  ;;  %17 = sbr.rel (!%p15_p5) target bundleno = 4 (0x4), region = 82 }
 0x1f5   :  { %1044 = vsyncpa [#allocation3], 1 }
 0x1f6   :  { %1046 = vsyncpa [#allocation3 + $0x1], 1 }

</bundles_post_ra>
